<compile_context>
chip_gen: v7x
topology: tpu7x:2x2x1
jax: 0.10.0
libtpu: 0.0.40
codegen_flags: <defaults>
</compile_context>

<pallas_src>
import functools

import numpy as np
import jax
import jax.numpy as jnp
from jax.experimental import pallas as pl
from jax.experimental.pallas import tpu as pltpu


# ----------------------------------------------------------------------------
# Small helpers
# ----------------------------------------------------------------------------
def _round_up(x, m):
    return ((x + m - 1) // m) * m


def _largest_tile(total, max_tile, unit):
    """Largest multiple of `unit` that divides `total` and is <= max_tile.

    `total` must be a positive multiple of `unit`."""
    t = min(max_tile, total)
    t -= t % unit
    t = max(t, unit)
    while total % t:
        t -= unit
    return t


@functools.lru_cache(maxsize=1)
def _device_kind():
    try:
        return jax.devices()[0].device_kind.lower()
    except Exception:  # pragma: no cover - defensive
        return ""


def _default_tm_cap():
    # v5e (and older): 4x 128x128 MXU -> 128 LHS rows fill it.
    # v6e / v7x: 2x 256x256 MXU -> 256 rows roughly double MXU occupancy.
    kind = _device_kind()
    if any(t in kind for t in ("v2", "v3", "v4", "v5")):
        return 128
    return 256


def _is_v7x():
    return "v7" in _device_kind()


# ----------------------------------------------------------------------------
# Pallas kernels: tiled (M, N, K) matmul + bias, k innermost ("arbitrary").
# Bias is folded into the accumulator init at k == 0.
# ----------------------------------------------------------------------------
def _linear_bias_f32out_kernel(x_ref, w_ref, b_ref, o_ref):
    # f32 output block doubles as the accumulator (resident across k).
    k = pl.program_id(2)

    @pl.when(k == 0)
    def _init():
        o_ref[...] = jnp.broadcast_to(b_ref[...], o_ref.shape)

    o_ref[...] += jnp.dot(x_ref[...], w_ref[...],
                          preferred_element_type=jnp.float32)


def _linear_bias_kernel(x_ref, w_ref, b_ref, o_ref, acc_ref):
    # f32 VMEM accumulator; single cast/store in the k == last epilogue.
    k = pl.program_id(2)

    @pl.when(k == 0)
    def _init():
        acc_ref[...] = jnp.broadcast_to(b_ref[...], acc_ref.shape)

    acc_ref[...] += jnp.dot(x_ref[...], w_ref[...],
                            preferred_element_type=jnp.float32)

    @pl.when(k == pl.num_programs(2) - 1)
    def _fin():
        o_ref[...] = acc_ref[...].astype(o_ref.dtype)


# ----------------------------------------------------------------------------
# Registration-time parameter prep (done ONCE per model, not per forward)
# ----------------------------------------------------------------------------
def pad_linear_params(weight, bias):
    """Pre-pad / pre-cast a Linear's parameters to lane-dense layouts.

    weight: (K, N) f32 -> (Kp, Np) bf16, Kp/Np multiples of 128, zero-padded.
    bias:   (N,)/(1,N) f32 -> (1, Np) f32 (kept f32 for the epilogue).
    """
    K, N = weight.shape
    Kp, Np = _round_up(K, 128), _round_up(N, 128)
    wp = weight.astype(jnp.bfloat16)
    if (Kp, Np) != (K, N):
        wp = jnp.zeros((Kp, Np), jnp.bfloat16).at[:K, :N].set(wp)
    bp = bias.reshape(1, N).astype(jnp.float32)
    if Np != N:
        bp = jnp.zeros((1, Np), jnp.float32).at[:, :N].set(bp)
    return wp, bp


# ----------------------------------------------------------------------------
# Kernel wrapper
# ----------------------------------------------------------------------------
def pallas_linear_padded(x, w_padded, b_padded, *, out_dtype=jnp.float32,
                         tm=None, tn=512, tk=1024):
    """y = pad(x) @ w_padded + b_padded on the MXU.

    x:        (B, K)     any float dtype (cast to bf16, zero-padded to (Bp, Kp))
    w_padded: (Kp, Ntot) bf16, Kp/Ntot multiples of 128 (rows >= K are zero)
    b_padded: (1, Ntot)  f32
    returns:  (B, Ntot)  out_dtype (caller slices the valid N columns)
    """
    B, K = x.shape
    Kp, Ntot = w_padded.shape
    assert K <= Kp and Kp % 128 == 0 and Ntot % 128 == 0

    # ---------------- tile selection ----------------
    if tm is None:
        tm = _default_tm_cap()              # 128 on v5e, 256 on v6e / v7x
    Bp = _round_up(B, 16)                   # bf16 sublane pack
    tm = _largest_tile(Bp, tm, 16)
    tn = _largest_tile(Ntot, tn, 128)
    tk = _largest_tile(Kp, tk, 128)

    # v7x has 2 TensorCores: keep at least one "parallel" axis >= 2-way so the
    # second core is not idle on tiny problems (irrelevant on v5e / v6e).
    if _is_v7x() and (Bp // tm) * (Ntot // tn) < 2:
        if tn >= 256:
            tn = _largest_tile(Ntot, tn // 2, 128)
        elif tm >= 32:
            tm = _largest_tile(Bp, tm // 2, 16)

    # ---------------- operand prep (fast path: no copies when aligned) -------
    if x.dtype != jnp.bfloat16:
        x = x.astype(jnp.bfloat16)
    if (Bp, Kp) != (B, K):
        x = jnp.zeros((Bp, Kp), jnp.bfloat16).at[:B, :K].set(x)

    grid = (Bp // tm, Ntot // tn, Kp // tk)
    in_specs = [
        pl.BlockSpec((tm, tk), lambda i, j, k: (i, k)),    # x
        pl.BlockSpec((tk, tn), lambda i, j, k: (k, j)),    # W (pure stream)
        pl.BlockSpec((1, tn), lambda i, j, k: (0, j)),     # bias, resident over k
    ]
    out_specs = pl.BlockSpec((tm, tn), lambda i, j, k: (i, j))
    cparams = pltpu.CompilerParams(
        dimension_semantics=("parallel", "parallel", "arbitrary"))
    # If a profile shows exposed DMA on the weight stream at large tk*tn, add
    # pipeline_mode=pl.Buffered(3) to the W BlockSpec (one extra tk*tn buffer).

    out_dtype = np.dtype(out_dtype)
    if out_dtype == np.float32:
        # Accumulate directly into the resident f32 output block: no scratch.
        out = pl.pallas_call(
            _linear_bias_f32out_kernel,
            out_shape=jax.ShapeDtypeStruct((Bp, Ntot), jnp.float32),
            grid=grid, in_specs=in_specs, out_specs=out_specs,
            compiler_params=cparams,
        )(x, w_padded, b_padded)
    else:
        out = pl.pallas_call(
            _linear_bias_kernel,
            out_shape=jax.ShapeDtypeStruct((Bp, Ntot), out_dtype),
            grid=grid, in_specs=in_specs, out_specs=out_specs,
            scratch_shapes=[pltpu.VMEM((tm, tn), jnp.float32)],
            compiler_params=cparams,
        )(x, w_padded, b_padded)

    return out if Bp == B else out[:B]


def pallas_linear(x, w, b, **kw):
    """Convenience: y = x @ w + b from unpadded f32 parameters."""
    wp, bp = pad_linear_params(w, jnp.asarray(b))
    y = pallas_linear_padded(x, wp, bp, **kw)
    N = w.shape[1]
    return y if y.shape[1] == N else y[:, :N]


# ----------------------------------------------------------------------------
# Representative registered sub-model (what the registrar stores)
# ----------------------------------------------------------------------------
class PallasLinearModel:
    """A Linear model whose forward is the Pallas kernel above.

    Parameters are pre-padded / pre-cast once at construction so that no
    per-forward HBM repack of the weights is needed.
    """

    def __init__(self, d_in, d_out, key):
        kw_, kb_ = jax.random.split(key)
        bound = 1.0 / float(d_in) ** 0.5
        self.d_in, self.d_out = d_in, d_out
        self.weight = jax.random.uniform(
            kw_, (d_in, d_out), jnp.float32, -bound, bound)
        self.bias = jax.random.uniform(
            kb_, (1, d_out), jnp.float32, -bound, bound)
        self.weight_padded, self.bias_padded = pad_linear_params(
            self.weight, self.bias)
        self.k_padded, self.n_padded = self.weight_padded.shape

    def __call__(self, x):
        y = pallas_linear_padded(x, self.weight_padded, self.bias_padded)
        return y if y.shape[1] == self.d_out else y[:, :self.d_out]

    def parameters(self):
        return [self.weight, self.bias]

    def to(self, device):
        # Analogue of nn.Module.to(device).
        if device is not None:
            for attr in ("weight", "bias", "weight_padded", "bias_padded"):
                setattr(self, attr, jax.device_put(getattr(self, attr), device))
        return self


# ----------------------------------------------------------------------------
# ModelRegistrar: same API / semantics as the PyTorch module
# ----------------------------------------------------------------------------
class ModelRegistrar:
    """Registers and manages multiple (Pallas-backed) models in a dict."""

    def __init__(self, model_dir, device):
        self.model_dict = {}
        self.model_dir = model_dir
        self.device = device
        self._version = 0          # bumped whenever a model is registered
        self._concat_cache = {}    # name -> (version, w_cat, b_cat, M, n_pad, n)

    @staticmethod
    def get_model_device(model):
        """Returns the device of the model's parameters."""
        return next(iter(next(iter(model.parameters())).devices()))

    def forward(self, *args, **kwargs):
        # Exact semantics of the PyTorch module's forward.
        raise NotImplementedError(
            'Although ModelRegistrar is a nn.Module, it is only to store parameters.')

    def __call__(self, *args, **kwargs):
        return self.forward(*args, **kwargs)

    def get_model(self, name, model_if_absent=None):
        if name in self.model_dict:
            return self.model_dict[name]
        elif model_if_absent is not None:
            self.model_dict[name] = model_if_absent.to(self.device)
            self._version += 1
            self._concat_cache.clear()   # invalidate cached weight slabs
            return self.model_dict[name]
        else:
            raise ValueError(f'{name} was never initialized in this Registrar!')

    def get_name_match(self, name):
        return [self.model_dict[k] for k in self.model_dict if name in k]

    def get_all_but_name_match(self, name):
        return [self.model_dict[k] for k in self.model_dict if name not in k]

    def run_name_match(self, name, x):
        """Run every name-matching Linear sub-model on `x` in ONE pallas_call.

        Pre-padded weights are concatenated along D_out (y = x @ [W1|...|WM])
        so x is streamed once and the per-model N fuses into large lane-dense
        tiles.  The concatenated slab is cached until the registry changes.
        """
        models = self.get_name_match(name)
        if not models:
            raise ValueError(f'No models matching {name!r} in this Registrar!')
        cached = self._concat_cache.get(name)
        if cached is None or cached[0] != self._version:
            n_pad, n_out, k_pad = (models[0].n_padded, models[0].d_out,
                                   models[0].k_padded)
            assert all(m.n_padded == n_pad and m.d_out == n_out and
                       m.k_padded == k_pad for m in models), \
                "name-matched models must share parameter shapes"
            w_cat = jnp.concatenate([m.weight_padded for m in models], axis=1)
            b_cat = jnp.concatenate([m.bias_padded for m in models], axis=1)
            cached = (self._version, w_cat, b_cat, len(models), n_pad, n_out)
            self._concat_cache[name] = cached
        _, w_cat, b_cat, M, n_pad, n_out = cached

        B = x.shape[0]
        y = pallas_linear_padded(x, w_cat, b_cat)       # (B, M * n_pad)
        y = y.reshape(B, M, n_pad).transpose(1, 0, 2)    # (M, B, n_pad)
        return y if n_pad == n_out else y[..., :n_out]

    def print_model_names(self):
        print(list(self.model_dict.keys()))

    # TODO(synk): save_models / load_models (torch.save / torch.load file I/O)
    # have no Pallas equivalent; omitted.


# ----------------------------------------------------------------------------
# Demo / self-test
# ----------------------------------------------------------------------------
if __name__ == "__main__":
    key = jax.random.PRNGKey(0)
    k1, k2, k3, k4, kx = jax.random.split(key, 5)

    # Small, non-lane-aligned shapes; the wrapper pads to (16, 128)-dense tiles.
    B, D_IN, D_OUT = 4, 32, 48

    registrar = ModelRegistrar(model_dir="/tmp", device=jax.devices()[0])

    enc_a = registrar.get_model(
        "edge_encoder/a", model_if_absent=PallasLinearModel(D_IN, D_OUT, k1))
    enc_b = registrar.get_model(
        "edge_encoder/b", model_if_absent=PallasLinearModel(D_IN, D_OUT, k2))
    dec = registrar.get_model(
        "node_future_decoder", model_if_absent=PallasLinearModel(D_IN, D_OUT, k3))

    # Registrar bookkeeping semantics (same as the nn.Module).
    assert registrar.get_model("edge_encoder/a") is enc_a
    assert len(registrar.get_name_match("encoder")) == 2
    assert len(registrar.get_all_but_name_match("encoder")) == 1
    try:
        registrar.get_model("does_not_exist")
        raise AssertionError("expected ValueError")
    except ValueError:
        pass
    try:
        registrar()  # forward must raise, just like the PyTorch module
        raise AssertionError("expected NotImplementedError")
    except NotImplementedError:
        pass

    x = jax.random.normal(kx, (B, D_IN), dtype=jnp.float32)

    # Reference: f32 matmul of the bf16-rounded operands (what the MXU computes).
    def ref(m):
        xr = x.astype(jnp.bfloat16).astype(jnp.float32)
        wr = m.weight.astype(jnp.bfloat16).astype(jnp.float32)
        return jnp.dot(xr, wr, precision=jax.lax.Precision.HIGHEST) + m.bias

    # 1) Single registered model through the Pallas kernel.
    y = jax.block_until_ready(dec(x))
    assert y.shape == (B, D_OUT)
    assert jnp.allclose(y, ref(dec), atol=1e-3, rtol=1e-3)

    # 2) Both "encoder" models in ONE pallas_call (N-concatenated weights).
    y_stack = jax.block_until_ready(registrar.run_name_match("encoder", x))
    assert y_stack.shape == (2, B, D_OUT)
    assert jnp.allclose(y_stack[0], ref(enc_a), atol=1e-3, rtol=1e-3)
    assert jnp.allclose(y_stack[1], ref(enc_b), atol=1e-3, rtol=1e-3)

    # 3) Second call reuses the cached concatenated weight slab.
    y_stack2 = jax.block_until_ready(registrar.run_name_match("encoder", x))
    assert jnp.allclose(y_stack, y_stack2)

    # 4) Registering a new matching model invalidates the cache.
    enc_c = registrar.get_model(
        "edge_encoder/c", model_if_absent=PallasLinearModel(D_IN, D_OUT, k4))
    y_stack3 = jax.block_until_ready(registrar.run_name_match("encoder", x))
    assert y_stack3.shape == (3, B, D_OUT)
    assert jnp.allclose(y_stack3[2], ref(enc_c), atol=1e-3, rtol=1e-3)

    print("KERNEL_OK")
</pallas_src>

<mosaic_0001>
module attributes {stable_mosaic.version = 11 : i64} {
  func.func @_linear_bias_f32out_kernel(%arg0: i32, %arg1: i32, %arg2: i32, %arg3: memref<16x128xbf16, #tpu.memory_space<vmem>>, %arg4: memref<128x128xbf16, #tpu.memory_space<vmem>>, %arg5: memref<1x128xf32, #tpu.memory_space<vmem>>, %arg6: memref<16x128xf32, #tpu.memory_space<vmem>>) attributes {dimension_semantics = [#tpu.dimension_semantics<parallel>, #tpu.dimension_semantics<parallel>, #tpu.dimension_semantics<arbitrary>], iteration_bounds = array<i64: 1, 1, 1>, scalar_prefetch = 0 : i64, scratch_operands = 0 : i64, tpu.core_type = #tpu.core_type<tc>, window_params = [{transform_indices = @transform_0, window_bounds = array<i64: 16, 128>}, {transform_indices = @transform_1, window_bounds = array<i64: 128, 128>}, {transform_indices = @transform_2, window_bounds = array<i64: 1, 128>}, {transform_indices = @transform_3, window_bounds = array<i64: 16, 128>}]} {
    %c0_i32 = arith.constant 0 : i32
    %0 = arith.cmpi eq, %arg2, %c0_i32 : i32
    %1 = arith.extui %0 : i1 to i32
    %c0_i32_0 = arith.constant 0 : i32
    %2 = arith.cmpi ne, %1, %c0_i32_0 : i32
    scf.if %2 {
      %c0_8 = arith.constant 0 : index
      %c0_9 = arith.constant 0 : index
      %9 = vector.load %arg5[%c0_8, %c0_9] : memref<1x128xf32, #tpu.memory_space<vmem>>, vector<1x128xf32>
      %10 = vector.shape_cast %9 : vector<1x128xf32> to vector<1x128xf32>
      %11 = vector.broadcast %10 : vector<1x128xf32> to vector<16x128xf32>
      %c0_10 = arith.constant 0 : index
      %c0_11 = arith.constant 0 : index
      %12 = vector.load %arg6[%c0_10, %c0_11] : memref<16x128xf32, #tpu.memory_space<vmem>>, vector<16x128xf32>
      tpu.vector_store %arg6[%c0_10, %c0_11], %11 {strides = array<i32>} : memref<16x128xf32, #tpu.memory_space<vmem>>, vector<16x128xf32>,
    } else {
    }
    %c0 = arith.constant 0 : index
    %c0_1 = arith.constant 0 : index
    %3 = vector.load %arg6[%c0, %c0_1] : memref<16x128xf32, #tpu.memory_space<vmem>>, vector<16x128xf32>
    %c0_2 = arith.constant 0 : index
    %c0_3 = arith.constant 0 : index
    %4 = vector.load %arg3[%c0_2, %c0_3] : memref<16x128xbf16, #tpu.memory_space<vmem>>, vector<16x128xbf16>
    %c0_4 = arith.constant 0 : index
    %c0_5 = arith.constant 0 : index
    %5 = vector.load %arg4[%c0_4, %c0_5] : memref<128x128xbf16, #tpu.memory_space<vmem>>, vector<128x128xbf16>
    %cst = arith.constant dense<0.000000e+00> : vector<16x128xf32>
    %6 = tpu.matmul %4, %5, %cst {dimension_numbers = #tpu.dot_dimension_numbers<[1], [0], [0], [1], [0, 0, 1, 1], [], []>} : vector<16x128xbf16>, vector<128x128xbf16>, vector<16x128xf32> -> vector<16x128xf32>
    %7 = arith.addf %3, %6 : vector<16x128xf32>
    %c0_6 = arith.constant 0 : index
    %c0_7 = arith.constant 0 : index
    %8 = vector.load %arg6[%c0_6, %c0_7] : memref<16x128xf32, #tpu.memory_space<vmem>>, vector<16x128xf32>
    tpu.vector_store %arg6[%c0_6, %c0_7], %7 {strides = array<i32>} : memref<16x128xf32, #tpu.memory_space<vmem>>, vector<16x128xf32>,
    return
  }
  func.func @transform_0(%arg0: i32, %arg1: i32, %arg2: i32) -> (i32, i32) {
    %c0_i32 = arith.constant 0 : i32
    return %arg0, %arg2 : i32, i32
  }
  func.func @transform_1(%arg0: i32, %arg1: i32, %arg2: i32) -> (i32, i32) {
    %c0_i32 = arith.constant 0 : i32
    return %arg2, %arg1 : i32, i32
  }
  func.func @transform_2(%arg0: i32, %arg1: i32, %arg2: i32) -> (i32, i32) {
    %c0_i32 = arith.constant 0 : i32
    %c0_i32_0 = arith.constant 0 : i32
    return %c0_i32, %arg1 : i32, i32
  }
  func.func @transform_3(%arg0: i32, %arg1: i32, %arg2: i32) -> (i32, i32) {
    %c0_i32 = arith.constant 0 : i32
    return %arg0, %arg1 : i32, i32
  }
}

</mosaic_0001>

<bundles_post_ra>
// kernel: tpu_custom_call.1
= control target key start
LH: loop header
LB: loop body
LE: loop exit
PB: predicated region body
PF: predicated region fallthrough
CT: control target
= control target key end

     0   :  { %8 = vsyncpa [#allocation3], 0  ;;  %s391_s0 = inlined_call_operand.hbm [shape: bf16[16,128], index: 0, kind: input, shape index: {}]   ;;  %s392_s1 = inlined_call_operand.hbm [shape: bf16[128,128], index: 1, kind: input, shape index: {}]   ;;  %s393_s2 = inlined_call_operand.vmem [shape: f32[1,128], index: 2, kind: input, shape index: {}]   ;;  %s394_s3 = inlined_call_operand.hbm [shape: f32[16,128], index: 3, kind: output, shape index: {}]  }
   0x1   :  { %9 = vsyncpa [#allocation6], 0 }
   0x2   :  { %10 = vsyncpa [#allocation4], 0  ;;  %s323_s12 = smov [#allocation2]   ;;  %s251_s16 = scalar_lea.hbm %s391_s0, 128 }
   0x3   :  { %s16_s13 = sshll.u32 %s323_s12, 4  ;;  %p252_p0 = scmp.ne.s32.totalorder %s391_s0, %s251_s16  ;;  %s17_s13 = int_to_ptr.vmem [resolvable:$true] %s16_s13 }
   0x4   :  { %p255_p1 = scmp.lt.u32.totalorder %s251_s16, %s391_s0 }
   0x6   :  { %p257_p2 = pnand %p255_p1, %p252_p0 }
   0x8   :  { %260 = shalt.err (!%p257_p2)
}
   0x9   :  { %s261_s21 = scalar_lea.vmem %s17_s13, 128  ;;  %p266_p4 = scmp.lt.s32.totalorder %s17_s13, %s17_s13 }
   0xa   :  { %p262_p3 = scmp.ne.s32.totalorder %s17_s13, %s261_s21  ;;  %p267_p5 = scmp.lt.s32.totalorder %s261_s21, %s261_s21 }
   0xc   :  { %p268_p6 = por %p267_p5, %p266_p4 }
   0xe   :  { %p269_p7 = pnand %p268_p6, %p262_p3 }
  0x10   :  { %272 = shalt.err (!%p269_p7)
}
  0x11   :  { %s324_s22 = smov 64   ;;  %s325_s23 = smov 4  }
  0x12   :  { %22 = dma.hbm_to_vmem [thread:$0]  %s391_s0, 128, %s17_s13, [#allocation3], %s324_s22, %s324_s22, %s325_s23  }
  0x13   :  { %s326_s26 = smov [#allocation5]   ;;  %s273_s30 = scalar_lea.hbm %s392_s1, 1024 }
  0x14   :  { %s28_s27 = sshll.u32 %s326_s26, 4  ;;  %p274_p8 = scmp.ne.s32.totalorder %s392_s1, %s273_s30  ;;  %s29_s27 = int_to_ptr.vmem [resolvable:$true] %s28_s27 }
  0x15   :  { %p277_p9 = scmp.lt.u32.totalorder %s273_s30, %s392_s1 }
  0x17   :  { %p279_p10 = pnand %p277_p9, %p274_p8 }
  0x19   :  { %282 = shalt.err (!%p279_p10)
}
  0x1a   :  { %s283_s8 = scalar_lea.vmem %s29_s27, 1024  ;;  %p288_p12 = scmp.lt.s32.totalorder %s29_s27, %s29_s27 }
  0x1b   :  { %p284_p11 = scmp.ne.s32.totalorder %s29_s27, %s283_s8  ;;  %p289_p13 = scmp.lt.s32.totalorder %s283_s8, %s283_s8 }
  0x1d   :  { %p290_p0 = por %p289_p13, %p288_p12 }
  0x1f   :  { %p291_p1 = pnand %p290_p0, %p284_p11 }
  0x21   :  { %294 = shalt.err (!%p291_p1)
}
  0x22   :  { %34 = dma.hbm_to_vmem [thread:$0]  %s392_s1, 1024, %s29_s27, [#allocation6], %s324_s22, %s324_s22, %s325_s23  }
  0x23   :  { %317 = dma.done.wait [#allocation3], 128  }
  0x24   :  { %318 = vsyncadd [#allocation3], 4294967168 }
  0x25   :  { %319 = dma.done.wait [#allocation6], 1024  }
  0x26   :  { %320 = vsyncadd [#allocation6], 4294966272  ;;  %v327_v0 = vmov 0.0   ;;  %vm328_vm0 = vmmov 0   ;;  %v242_v1 = vld [vmem:[#allocation5] sm:$0xff]   ;;  %v243_v2 = vld [vmem:[#allocation5 + $0x8] sm:$0xff]  }
  0x27   :  { %213 = vmatprep.subr.bf16.mxu0 %v327_v0  ;;  %229 = vmatprep.mubr.msk.bf16.mxu0 %vm328_vm0, %v327_v0  ;;  %v244_v3 = vld [vmem:[#allocation5 + $0x10] sm:$0xff]   ;;  %v245_v4 = vld [vmem:[#allocation5 + $0x18] sm:$0xff]   ;;  %v246_v5 = vld [vmem:[#allocation5 + $0x20] sm:$0xff]   ;;  %s329_s11 = smov [#allocation7]  }
  0x28   :  { %214 = vmatpush3.bf16.msra.mxu0 %v242_v1  ;;  %v247_v6 = vld [vmem:[#allocation5 + $0x28] sm:$0xff]   ;;  %v248_v7 = vld [vmem:[#allocation5 + $0x30] sm:$0xff]   ;;  %v249_v8 = vld [vmem:[#allocation5 + $0x38] sm:$0xff]   ;;  %s181_s12 = sshll.u32 %s329_s11, 4  ;;  %s182_s12 = int_to_ptr.vmem [resolvable:$true] %s181_s12 }
  0x29   :  { %215 = vmatprep.subr.bf16.mxu0 %v327_v0  ;;  %v250_v9 = vld [vmem:[#allocation2] sm:$0xff]   ;;  %s295_s13 = scalar_lea.vmem %s182_s12, 256  ;;  %p300_p3 = scmp.lt.s32.totalorder %s182_s12, %s182_s12 }
  0x2a   :  { %v194_v10 = vld [vmem:[%s393_s2] ss:$0 sm:$0xff]  ;;  %p296_p2 = scmp.ne.s32.totalorder %s182_s12, %s295_s13  ;;  %p301_p4 = scmp.lt.s32.totalorder %s295_s13, %s295_s13 }
  0x2c   :  { %216 = vmatpush3.bf16.msra.mxu0 %v243_v2  ;;  %p302_p5 = por %p301_p4, %p300_p3 }
  0x2d   :  { %217 = vmatprep.subr.bf16.mxu0 %v327_v0 }
  0x2e   :  { %p303_p6 = pnand %p302_p5, %p296_p2 }
  0x30   :  { %218 = vmatpush3.bf16.msra.mxu0 %v244_v3 }
  0x31   :  { %219 = vmatprep.subr.bf16.mxu0 %v327_v0 }
  0x34   :  { %220 = vmatpush3.bf16.msra.mxu0 %v245_v4 }
  0x35   :  { %221 = vmatprep.subr.bf16.mxu0 %v327_v0 }
  0x38   :  { %222 = vmatpush3.bf16.msra.mxu0 %v246_v5 }
  0x39   :  { %223 = vmatprep.subr.bf16.mxu0 %v327_v0 }
  0x3c   :  { %224 = vmatpush3.bf16.msra.mxu0 %v247_v6 }
  0x3d   :  { %225 = vmatprep.subr.bf16.mxu0 %v327_v0 }
  0x40   :  { %226 = vmatpush3.bf16.msra.mxu0 %v248_v7 }
  0x41   :  { %227 = vmatprep.subr.bf16.mxu0 %v327_v0 }
  0x44   :  { %228 = vmatpush3.bf16.msra.mxu0 %v249_v8 }
  0x47   :  { %230 = vmatmul.mubr.bf16.vlgmr.msra.gmra.mrb[0].mxu0 %v250_v9 }
 0x11a   :  { %v165_v11 = vpop.f32.mrb[0].mxu0 }
 0x11b   :  { %v172_v12 = vadd.f32 %v194_v10, %v165_v11  ;;  %v231_v13 = vpop.f32.mrb[1].mxu0 }
 0x11c   :  { %v168_v14 = vpop.f32.mrb[2].mxu0 }
 0x11d   :  { %174 = vst [vmem:[#allocation7] sm:$0xff] %v172_v12  ;;  %v173_v15 = vadd.f32 %v194_v10, %v168_v14  ;;  %v232_v16 = vpop.f32.mrb[3].mxu0 }
 0x11f   :  { %175 = vst [vmem:[#allocation7 + $0x8] sm:$0xff] %v173_v15 }
 0x120   :  { %306 = shalt.err (!%p303_p6)
}
 0x121   :  { %s307_s15 = scalar_lea.hbm %s394_s3, 256 }
 0x122   :  { %p308_p7 = scmp.ne.s32.totalorder %s394_s3, %s307_s15  ;;  %p311_p8 = scmp.lt.u32.totalorder %s307_s15, %s394_s3 }
 0x124   :  { %p313_p9 = pnand %p311_p8, %p308_p7 }
 0x126   :  { %316 = shalt.err (!%p313_p9)
}
 0x127   :  { %s330_s20 = smov 128   ;;  %s331_s21 = smov 8  }
 0x128   :  { %187 = dma.vmem_to_hbm [thread:$0]  %s182_s12, 256, %s394_s3, [#allocation4], %s330_s20, %s330_s20, %s331_s21  }
 0x129   :  { %321 = dma.done.wait [#allocation4], 256  }
 0x12a   :  { %322 = vsyncadd [#allocation4], 4294967040 }
 0x12b   :  { %191 = vsyncpa [#allocation3], 1 }
 0x12c   :  { %192 = vsyncpa [#allocation6], 1 }
 0x12d   :  { %193 = vsyncpa [#allocation4], 1 }

</bundles_post_ra>
